<compile_context>
chip_gen: v6e
topology: v6e:2x2x1
jax: 0.10.0
libtpu: 0.0.40
codegen_flags: <defaults>
</compile_context>

<pallas_src>
import jax
import jax.numpy as jnp
from jax.experimental import pallas as pl
from jax.experimental.pallas import tpu as pltpu

_LANE = 128          # vreg lane width
_SUBLANE = 8         # vreg sublane width (f32)


def _round_up(v, m):
    return ((v + m - 1) // m) * m


def _content_loss_kernel(x_ref, t_ref, out_ref, loss_ref):
    """x_ref/t_ref/out_ref: (row_tile, 128) blocks; loss_ref: (1, 8, 128) partial sums."""
    i = pl.program_id(1)

    @pl.when(i == 0)
    def _():
        loss_ref[...] = jnp.zeros_like(loss_ref)

    x = x_ref[...]
    t = t_ref[...]

    # Elementwise hot path: return input / 2.
    out_ref[...] = (x * jnp.asarray(0.5, x.dtype)).astype(out_ref.dtype)

    # Reduction hot path: accumulate sum of squared differences in vector form.
    d = x.astype(jnp.float32) - t.astype(jnp.float32)
    sq = d * d
    # (row_tile, 128) -> (row_tile/8, 8, 128); summing over the leading axis is
    # plain vreg adds on the VPU (no cross-lane / cross-sublane XLU work, the
    # reshape does not cross (8,128) tile boundaries).
    partial = sq.reshape(-1, _SUBLANE, _LANE).sum(axis=0)          # (8, 128)
    loss_ref[...] += partial[None]                                  # (1, 8, 128)


def content_loss_forward(x, target, *, max_row_tile=2048, num_splits=2):
    """Returns (x / 2, mse_loss(x, target)). x, target: same shape (e.g. NCHW)."""
    assert x.shape == target.shape, "input and target must have the same shape"
    orig_shape = x.shape
    n_elems = x.size

    # Lane-dense 2-D slab layout with big blocks; pad so the grid tiles evenly.
    rows = pl.cdiv(n_elems, _LANE)
    rows_per_split = pl.cdiv(rows, num_splits)
    row_tile = min(max_row_tile, _round_up(max(rows_per_split, 1), _SUBLANE))
    steps = pl.cdiv(rows_per_split, row_tile)
    padded_rows = num_splits * steps * row_tile
    padded_n = padded_rows * _LANE

    xf = x.reshape(-1)
    tf = target.reshape(-1)
    if padded_n != n_elems:
        pad = padded_n - n_elems
        # Zero padding in BOTH operands => zero contribution to the SSE.
        xf = jnp.pad(xf, (0, pad))
        tf = jnp.pad(tf, (0, pad))
    x2d = xf.reshape(padded_rows, _LANE)
    t2d = tf.reshape(padded_rows, _LANE)

    def tile_map(c, i, _steps=steps):
        return (c * _steps + i, 0)

    out2d, partials = pl.pallas_call(
        _content_loss_kernel,
        out_shape=(
            jax.ShapeDtypeStruct((padded_rows, _LANE), x.dtype),
            jax.ShapeDtypeStruct((num_splits, _SUBLANE, _LANE), jnp.float32),
        ),
        grid_spec=pltpu.PrefetchScalarGridSpec(
            num_scalar_prefetch=0,
            grid=(num_splits, steps),
            in_specs=[
                pl.BlockSpec((row_tile, _LANE), tile_map),
                pl.BlockSpec((row_tile, _LANE), tile_map),
            ],
            out_specs=[
                pl.BlockSpec((row_tile, _LANE), tile_map),
                # Per-split partial-sum block stays resident across the
                # reduction ("arbitrary") axis -> acts as the accumulator.
                pl.BlockSpec((1, _SUBLANE, _LANE), lambda c, i: (c, 0, 0)),
            ],
        ),
        compiler_params=pltpu.CompilerParams(
            # Leading axis parallel (v7x dual-TC sharding), reduction axis arbitrary.
            dimension_semantics=("parallel", "arbitrary"),
            # 3 streamed operands x 2 buffers x ~1 MiB blocks ~= 6 MiB; ample
            # headroom even on v5e (16 MiB default scoped VMEM) / v7x (64 MiB VMEM).
            vmem_limit_bytes=32 * 1024 * 1024,
        ),
    )(x2d, t2d)

    if padded_n != n_elems:
        out = out2d.reshape(-1)[:n_elems].reshape(orig_shape)
    else:
        out = out2d.reshape(orig_shape)

    # Final tiny (num_splits*8*128-element) reduction + mean normalization in
    # plain JAX — negligible next to the kernel's HBM traffic.
    loss = jnp.sum(partials) / jnp.float32(n_elems)
    return out, loss


if __name__ == "__main__":
    key = jax.random.PRNGKey(0)
    kx, kt = jax.random.split(key)

    fwd = jax.jit(content_loss_forward)

    # Small conv-feature-map style input: NCHW = (2, 4, 16, 16)
    x = jax.random.normal(kx, (2, 4, 16, 16), dtype=jnp.float32)
    target = jax.random.normal(kt, (2, 4, 16, 16), dtype=jnp.float32)

    out, loss = fwd(x, target)
    out = jax.block_until_ready(out)
    loss = jax.block_until_ready(loss)

    ref_out = x / 2
    ref_loss = jnp.mean((x - target) ** 2)
    assert jnp.allclose(out, ref_out, atol=1e-6, rtol=1e-6)
    assert jnp.allclose(loss, ref_loss, atol=1e-6, rtol=1e-6)

    # Second check: non-128-divisible size exercises the padded-tail path.
    kx2, kt2 = jax.random.split(kt)
    x2 = jax.random.normal(kx2, (2, 8, 37, 53), dtype=jnp.float32)
    t2 = jax.random.normal(kt2, (2, 8, 37, 53), dtype=jnp.float32)
    out2, loss2 = fwd(x2, t2)
    out2 = jax.block_until_ready(out2)
    loss2 = jax.block_until_ready(loss2)
    assert jnp.allclose(out2, x2 / 2, atol=1e-6, rtol=1e-6)
    assert jnp.allclose(loss2, jnp.mean((x2 - t2) ** 2), atol=1e-6, rtol=1e-5)

    print("KERNEL_OK")
</pallas_src>

<mosaic_0001>
module attributes {stable_mosaic.version = 11 : i64} {
  func.func @_content_loss_kernel(%arg0: i32, %arg1: i32, %arg2: memref<8x128xf32, #tpu.memory_space<vmem>>, %arg3: memref<8x128xf32, #tpu.memory_space<vmem>>, %arg4: memref<8x128xf32, #tpu.memory_space<vmem>>, %arg5: memref<1x8x128xf32, #tpu.memory_space<vmem>>) attributes {dimension_semantics = [#tpu.dimension_semantics<parallel>, #tpu.dimension_semantics<arbitrary>], iteration_bounds = array<i64: 2, 1>, scalar_prefetch = 0 : i64, scratch_operands = 0 : i64, tpu.core_type = #tpu.core_type<tc>, window_params = [{transform_indices = @transform_0, window_bounds = array<i64: 8, 128>}, {transform_indices = @transform_1, window_bounds = array<i64: 8, 128>}, {transform_indices = @transform_2, window_bounds = array<i64: 8, 128>}, {transform_indices = @transform_3, window_bounds = array<i64: 1, 8, 128>}]} {
    %c0_i32 = arith.constant 0 : i32
    %0 = arith.cmpi eq, %arg1, %c0_i32 : i32
    %1 = arith.extui %0 : i1 to i32
    %c0_i32_0 = arith.constant 0 : i32
    %2 = arith.cmpi ne, %1, %c0_i32_0 : i32
    scf.if %2 {
      %cst_13 = arith.constant 0.000000e+00 : f32
      %16 = vector.broadcast %cst_13 : f32 to vector<1x8x128xf32>
      %c0_14 = arith.constant 0 : index
      %c0_15 = arith.constant 0 : index
      %c0_16 = arith.constant 0 : index
      %17 = vector.load %arg5[%c0_14, %c0_15, %c0_16] : memref<1x8x128xf32, #tpu.memory_space<vmem>>, vector<1x8x128xf32>
      tpu.vector_store %arg5[%c0_14, %c0_15, %c0_16], %16 {strides = array<i32>} : memref<1x8x128xf32, #tpu.memory_space<vmem>>, vector<1x8x128xf32>,
    } else {
    }
    %c0 = arith.constant 0 : index
    %c0_1 = arith.constant 0 : index
    %3 = vector.load %arg2[%c0, %c0_1] : memref<8x128xf32, #tpu.memory_space<vmem>>, vector<8x128xf32>
    %c0_2 = arith.constant 0 : index
    %c0_3 = arith.constant 0 : index
    %4 = vector.load %arg3[%c0_2, %c0_3] : memref<8x128xf32, #tpu.memory_space<vmem>>, vector<8x128xf32>
    %cst = arith.constant 5.000000e-01 : f32
    %5 = vector.broadcast %cst : f32 to vector<8x128xf32>
    %6 = arith.mulf %3, %5 : vector<8x128xf32>
    %c0_4 = arith.constant 0 : index
    %c0_5 = arith.constant 0 : index
    %7 = vector.load %arg4[%c0_4, %c0_5] : memref<8x128xf32, #tpu.memory_space<vmem>>, vector<8x128xf32>
    tpu.vector_store %arg4[%c0_4, %c0_5], %6 {strides = array<i32>} : memref<8x128xf32, #tpu.memory_space<vmem>>, vector<8x128xf32>,
    %8 = arith.subf %3, %4 : vector<8x128xf32>
    %9 = arith.mulf %8, %8 : vector<8x128xf32>
    %10 = vector.shape_cast %9 : vector<8x128xf32> to vector<1x8x128xf32>
    %cst_6 = arith.constant dense<0.000000e+00> : vector<8x128xf32>
    %11 = vector.multi_reduction <add>, %10, %cst_6 [0] : vector<1x8x128xf32> to vector<8x128xf32>
    %c0_7 = arith.constant 0 : index
    %c0_8 = arith.constant 0 : index
    %c0_9 = arith.constant 0 : index
    %12 = vector.load %arg5[%c0_7, %c0_8, %c0_9] : memref<1x8x128xf32, #tpu.memory_space<vmem>>, vector<1x8x128xf32>
    %13 = vector.shape_cast %11 : vector<8x128xf32> to vector<1x8x128xf32>
    %14 = arith.addf %12, %13 : vector<1x8x128xf32>
    %c0_10 = arith.constant 0 : index
    %c0_11 = arith.constant 0 : index
    %c0_12 = arith.constant 0 : index
    %15 = vector.load %arg5[%c0_10, %c0_11, %c0_12] : memref<1x8x128xf32, #tpu.memory_space<vmem>>, vector<1x8x128xf32>
    tpu.vector_store %arg5[%c0_10, %c0_11, %c0_12], %14 {strides = array<i32>} : memref<1x8x128xf32, #tpu.memory_space<vmem>>, vector<1x8x128xf32>,
    return
  }
  func.func @transform_0(%arg0: i32, %arg1: i32) -> (i32, i32) {
    %c1_i32 = arith.constant 1 : i32
    %0 = arith.muli %arg0, %c1_i32 : i32
    %1 = arith.addi %0, %arg1 : i32
    %c0_i32 = arith.constant 0 : i32
    %c0_i32_0 = arith.constant 0 : i32
    return %1, %c0_i32 : i32, i32
  }
  func.func @transform_1(%arg0: i32, %arg1: i32) -> (i32, i32) {
    %c1_i32 = arith.constant 1 : i32
    %0 = arith.muli %arg0, %c1_i32 : i32
    %1 = arith.addi %0, %arg1 : i32
    %c0_i32 = arith.constant 0 : i32
    %c0_i32_0 = arith.constant 0 : i32
    return %1, %c0_i32 : i32, i32
  }
  func.func @transform_2(%arg0: i32, %arg1: i32) -> (i32, i32) {
    %c1_i32 = arith.constant 1 : i32
    %0 = arith.muli %arg0, %c1_i32 : i32
    %1 = arith.addi %0, %arg1 : i32
    %c0_i32 = arith.constant 0 : i32
    %c0_i32_0 = arith.constant 0 : i32
    return %1, %c0_i32 : i32, i32
  }
  func.func @transform_3(%arg0: i32, %arg1: i32) -> (i32, i32, i32) {
    %c0_i32 = arith.constant 0 : i32
    %c0_i32_0 = arith.constant 0 : i32
    %c0_i32_1 = arith.constant 0 : i32
    return %arg0, %c0_i32, %c0_i32_0 : i32, i32, i32
  }
}

</mosaic_0001>

<bundles_post_ra>
// kernel: content_loss_forward.1
= control target key start
LH: loop header
LB: loop body
LE: loop exit
PB: predicated region body
PF: predicated region fallthrough
CT: control target
= control target key end

     0   :  { %s428_s12 = smov 0   ;;  %s430_s13 = smov 0   ;;  %s455_s0 = inlined_call_operand.vmem [shape: f32[16,128], index: 0, kind: input, shape index: {}]   ;;  %s456_s1 = inlined_call_operand.vmem [shape: f32[16,128], index: 1, kind: input, shape index: {}]   ;;  %s457_s2 = inlined_call_operand.vmem [shape: f32[16,128], index: 2, kind: output, shape index: {0}]   ;;  %s458_s3 = inlined_call_operand.vmem [shape: f32[2,8,128], index: 3, kind: output, shape index: {1}]  }
   0x1   :  { %s432_s14 = smov 0  }
   0x2 LB: > { %s26_s15 = sadd.s32 1, %s402_s13  ;;  %p352_p0 = scmp.ge.s32.totalorder %s406_s14, 1  ;;  %s406_s14 = sphi %s432_s14, %s14_s14   ;;  %s402_s13 = sphi %s430_s13, %s460_s13   ;;  %s398_s12 = sphi %s428_s12, %s459_s12  }
   0x3   : > { %p28_p1 = scmp.ge.s32.totalorder %s26_s15, 2  ;;  %p170_p2 = scmp.lt.s32.totalorder %s406_s14, 3 }
   0x5   : > { %s462_s15 = smov (%p28_p1, %s26_s15), 0  ;;  %p171_p3 = pnand %p352_p0, %p170_p2 }
   0x6   : > { %p204_p4 = scmp.lt.s32.totalorder (!%p171_p3), %s398_s12, 1 }
   0x7   : > { %174 = sbr.rel (%p171_p3) target bundleno = 22 (0x16), region = 28 }
   0xc   : > { %s464_s12 = smov (!%p204_p4, %s398_s12), 1 }
   0xd   : > { %s353_s16 = sshll.u32 %s464_s12, 3 }
   0xe   : > { %s207_s19 = scalar_lea.vmem %s455_s0, %s353_s16  ;;  %s213_s22 = scalar_lea.vmem %s456_s1, %s353_s16 }
   0xf   : > { %s219_s25 = scalar_lea.vmem %s457_s2, %s353_s16  ;;  %v230_v0 = vld [vmem:[%s207_s19] sm:$0xff]  ;;  %s224_s28 = scalar_lea.vmem %s458_s3, %s353_s16 }
  0x10   : > { %v231_v1 = vld [vmem:[%s213_s22] sm:$0xff]  ;;  %v232_v2 = vmul.f32 0.5, %v230_v0 }
  0x11   : > { %v234_v3 = vsub.f32 %v230_v0, %v231_v1 }
  0x12   : > { %233 = vst [vmem:[%s219_s25] sm:$0xff] %v232_v2 }
  0x13   : > { %v235_v4 = vmul.f32 %v234_v3, %v234_v3 }
  0x15   : > { %239 = vst [vmem:[%s224_s28] sm:$0xff] %v235_v4 }
  0x16 PF: > { %s14_s14 = sadd.s32 1, %s406_s14   ;;  %s459_s12 = smov %s402_s13 }
  0x17   : > { %p11_p5 = scmp.ge.s32.totalorder %s14_s14, 4   ;;  %s460_s13 = smov %s462_s15 }
  0x19   :  { %13 = sbr.rel (!%p11_p5) target bundleno = 2 (0x2), region = 77 }

</bundles_post_ra>
